<compile_context>
chip_gen: v7x
topology: tpu7x:2x2x1
jax: 0.10.0
libtpu: 0.0.40
codegen_flags: <defaults>
</compile_context>

<pallas_src>
import jax
import jax.numpy as jnp
from jax.experimental import pallas as pl
from jax.experimental.pallas import tpu as pltpu

# ---- quantizer constants (deterministic, stands in for brevitas proxy state) ----
BITS = 4
SIGNED = False
NARROW_RANGE = False
SCALE = 0.25  # power of two -> folding 1/SCALE into the affine is exact.
QMIN = 0.0 if not SIGNED else -(2.0 ** (BITS - 1)) + float(NARROW_RANGE)
QMAX = QMIN + 2.0 ** BITS - 1.0 - float(NARROW_RANGE)

_LANE = 128
_TILE_BYTES_TARGET = 1 << 20   # ~1 MiB f32 input tile: HBM roofline saturates near
                               # 512-row tiles for elementwise; bigger buys nothing.
_MIN_STEPS = 8                 # >= 4 grid steps per TensorCore on v7x megacore.
_MAX_TILE_F = 4096             # feature-tile cap (multiple of 128); keeps very wide
                               # activations inside v7x's 32 MiB scoped VMEM.


# ---------------------------------------------------------------------------
# Kernels (specialized on is_bin_output at trace time)
# ---------------------------------------------------------------------------
def _float_kernel(x_ref, pre_s_ref, pre_b_ref, post_s_ref, post_b_ref, o_ref):
    """float-output path: pre-affine -> INT quant/dequant -> post-affine.

    pre_s/pre_b already include the 1/SCALE factor (quant), post_s already
    includes the SCALE factor (dequant), so this is FMA -> round/clip -> FMA.
    """
    x = x_ref[...].astype(jnp.float32)
    q = jnp.clip(jnp.round(x * pre_s_ref[...] + pre_b_ref[...]), QMIN, QMAX)
    o_ref[...] = (q * post_s_ref[...] + post_b_ref[...]).astype(o_ref.dtype)


def _bin_kernel(x_ref, pre_s_ref, pre_b_ref, o_ref):
    """bin-output path: pre-affine -> integer quant codes only."""
    x = x_ref[...].astype(jnp.float32)
    q = jnp.clip(jnp.round(x * pre_s_ref[...] + pre_b_ref[...]), QMIN, QMAX)
    # TODO(synk): PyTorch casts to int64; 4-bit codes fit int8, which quarters the
    # write bandwidth on TPU. Widen outside the kernel if a consumer requires it.
    o_ref[...] = q.astype(o_ref.dtype)


# ---------------------------------------------------------------------------
# Tile selection
# ---------------------------------------------------------------------------
def _choose_tile_f(F):
    # Full feature extent (legal block even if not a multiple of 128) unless the
    # activation is extremely wide, in which case tile it in 128-multiples.
    return F if F <= _MAX_TILE_F else _MAX_TILE_F


def _choose_tile_b(B, tile_f, align):
    """Batch tile: ~1 MiB f32 input tiles, >= _MIN_STEPS grid steps when B allows,
    and an even step count so v7x's two TensorCores stay balanced."""
    if B <= align:
        return B
    rows = max(align, (_TILE_BYTES_TARGET // (4 * tile_f)) // align * align)
    steps = pl.cdiv(B, rows)
    if B >= _MIN_STEPS * align:
        steps = max(steps, _MIN_STEPS)
    if steps > 1 and steps % 2:
        steps += 1
    tile_b = pl.cdiv(pl.cdiv(B, steps), align) * align
    return min(max(align, tile_b), B)


# ---------------------------------------------------------------------------
# Public wrapper
# ---------------------------------------------------------------------------
def quant_brevitas_activation(x, pre_scale, pre_shift, post_scale=None,
                              post_shift=None, *, is_bin_output=False,
                              out_dtype=None):
    """QuantBrevitasActivation.forward on flattened activations.

    x: (B, F) float32. Per-feature params: (1, F) float32.
    Returns (B, F) float (out_dtype, default f32) if not is_bin_output,
    else (B, F) int8 quant codes.
    """
    B, F = x.shape
    if is_bin_output:
        # int8 codes: safe for BITS <= 8; tie the dtype to the quantizer range.
        assert -128.0 <= QMIN and QMAX <= 127.0, "quant codes do not fit int8"
        out_dtype = jnp.int8
    elif out_dtype is None:
        out_dtype = jnp.float32  # pass jnp.bfloat16 to halve write traffic

    # Fold the quant scale into the per-feature params (O(F) wrapper work; exact
    # because SCALE is a power of two): the pre-affine lands directly in
    # integer-code space, the post-affine absorbs the dequant.
    inv_s = jnp.float32(1.0 / SCALE)
    pre_s = pre_scale.astype(jnp.float32) * inv_s
    pre_b = pre_shift.astype(jnp.float32) * inv_s

    align = 32 if is_bin_output else 8   # sublane alignment for the output dtype
    tile_f = _choose_tile_f(F)
    tile_b = _choose_tile_b(B, tile_f, align)
    grid = (pl.cdiv(B, tile_b), pl.cdiv(F, tile_f))

    x_spec = pl.BlockSpec((tile_b, tile_f), lambda i, j: (i, j))
    p_spec = pl.BlockSpec((1, tile_f), lambda i, j: (0, j))

    if is_bin_output:
        kernel = _bin_kernel
        inputs = (x, pre_s, pre_b)
        in_specs = [x_spec, p_spec, p_spec]
    else:
        kernel = _float_kernel
        post_s = post_scale.astype(jnp.float32) * jnp.float32(SCALE)
        post_b = post_shift.astype(jnp.float32)
        inputs = (x, pre_s, pre_b, post_s, post_b)
        in_specs = [x_spec, p_spec, p_spec, p_spec, p_spec]

    return pl.pallas_call(
        kernel,
        out_shape=jax.ShapeDtypeStruct((B, F), out_dtype),
        grid_spec=pltpu.PrefetchScalarGridSpec(
            num_scalar_prefetch=0,
            grid=grid,
            in_specs=in_specs,
            out_specs=x_spec,
        ),
        compiler_params=pltpu.CompilerParams(
            # Both axes write disjoint output blocks -> both parallel; lets v7x
            # megacore shard the grid across its 2 TensorCores.
            dimension_semantics=("parallel", "parallel")),
    )(*inputs)


# ---------------------------------------------------------------------------
# Pure-JAX reference (original, unfolded semantics)
# ---------------------------------------------------------------------------
def _reference(x, pre_scale, pre_shift, post_scale, post_shift, is_bin_output):
    y = x * pre_scale + pre_shift
    q = jnp.clip(jnp.round(y / SCALE), QMIN, QMAX)
    if is_bin_output:
        return q.astype(jnp.int32)
    return (q * SCALE) * post_scale + post_shift


if __name__ == "__main__":
    key = jax.random.PRNGKey(0)
    # Small shapes: one ragged B/F (exercises masked partial batch/lane tails,
    # no wrapper pad/slice), one aligned with multiple grid steps (exercises
    # tile sizing / parallel batch axis).
    for (B, F) in [(56, 96), (256, 128)]:
        k1, k2, k3, k4, k5, key = jax.random.split(key, 6)
        x = jax.random.normal(k1, (B, F), dtype=jnp.float32) * 2.0

        # deterministic synthetic pre/post transform parameters (per-feature affines)
        pre_scale = 1.0 + 0.1 * jax.random.normal(k2, (1, F), dtype=jnp.float32)
        pre_shift = 0.1 * jax.random.normal(k3, (1, F), dtype=jnp.float32)
        post_scale = 1.0 + 0.05 * jax.random.normal(k4, (1, F), dtype=jnp.float32)
        post_shift = 0.05 * jax.random.normal(k5, (1, F), dtype=jnp.float32)

        # float-output path (is_bin_output = False)
        out_f = jax.block_until_ready(quant_brevitas_activation(
            x, pre_scale, pre_shift, post_scale, post_shift, is_bin_output=False))
        ref_f = _reference(x, pre_scale, pre_shift, post_scale, post_shift, False)
        assert out_f.shape == (B, F) and out_f.dtype == jnp.float32
        assert jnp.allclose(out_f, ref_f, atol=1e-5), f"float path mismatch ({B},{F})"

        # bin-output path (is_bin_output = True)
        out_i = jax.block_until_ready(quant_brevitas_activation(
            x, pre_scale, pre_shift, is_bin_output=True))
        ref_i = _reference(x, pre_scale, pre_shift, None, None, True)
        assert out_i.shape == (B, F) and out_i.dtype == jnp.int8
        assert jnp.array_equal(out_i.astype(jnp.int32), ref_i), f"bin path mismatch ({B},{F})"

    print("KERNEL_OK")
</pallas_src>

<mosaic_0001>
module attributes {stable_mosaic.version = 11 : i64} {
  func.func @_float_kernel(%arg0: i32, %arg1: i32, %arg2: memref<56x96xf32, #tpu.memory_space<vmem>>, %arg3: memref<1x96xf32, #tpu.memory_space<vmem>>, %arg4: memref<1x96xf32, #tpu.memory_space<vmem>>, %arg5: memref<1x96xf32, #tpu.memory_space<vmem>>, %arg6: memref<1x96xf32, #tpu.memory_space<vmem>>, %arg7: memref<56x96xf32, #tpu.memory_space<vmem>>) attributes {dimension_semantics = [#tpu.dimension_semantics<parallel>, #tpu.dimension_semantics<parallel>], iteration_bounds = array<i64: 1, 1>, scalar_prefetch = 0 : i64, scratch_operands = 0 : i64, tpu.core_type = #tpu.core_type<tc>, window_params = [{transform_indices = @transform_0, window_bounds = array<i64: 56, 96>}, {transform_indices = @transform_1, window_bounds = array<i64: 1, 96>}, {transform_indices = @transform_2, window_bounds = array<i64: 1, 96>}, {transform_indices = @transform_3, window_bounds = array<i64: 1, 96>}, {transform_indices = @transform_4, window_bounds = array<i64: 1, 96>}, {transform_indices = @transform_5, window_bounds = array<i64: 56, 96>}]} {
    %c0 = arith.constant 0 : index
    %c0_0 = arith.constant 0 : index
    %0 = vector.load %arg2[%c0, %c0_0] : memref<56x96xf32, #tpu.memory_space<vmem>>, vector<56x96xf32>
    %c0_1 = arith.constant 0 : index
    %c0_2 = arith.constant 0 : index
    %1 = vector.load %arg3[%c0_1, %c0_2] : memref<1x96xf32, #tpu.memory_space<vmem>>, vector<1x96xf32>
    %2 = vector.broadcast %1 : vector<1x96xf32> to vector<56x96xf32>
    %3 = arith.mulf %0, %2 : vector<56x96xf32>
    %c0_3 = arith.constant 0 : index
    %c0_4 = arith.constant 0 : index
    %4 = vector.load %arg4[%c0_3, %c0_4] : memref<1x96xf32, #tpu.memory_space<vmem>>, vector<1x96xf32>
    %5 = vector.broadcast %4 : vector<1x96xf32> to vector<56x96xf32>
    %6 = arith.addf %3, %5 : vector<56x96xf32>
    %7 = math.roundeven %6 : vector<56x96xf32>
    %cst = arith.constant 0.000000e+00 : f32
    %cst_5 = arith.constant 1.500000e+01 : f32
    %8 = vector.broadcast %cst : f32 to vector<56x96xf32>
    %9 = arith.maximumf %8, %7 : vector<56x96xf32>
    %10 = vector.broadcast %cst_5 : f32 to vector<56x96xf32>
    %11 = arith.minimumf %10, %9 : vector<56x96xf32>
    %c0_6 = arith.constant 0 : index
    %c0_7 = arith.constant 0 : index
    %12 = vector.load %arg5[%c0_6, %c0_7] : memref<1x96xf32, #tpu.memory_space<vmem>>, vector<1x96xf32>
    %13 = vector.broadcast %12 : vector<1x96xf32> to vector<56x96xf32>
    %14 = arith.mulf %11, %13 : vector<56x96xf32>
    %c0_8 = arith.constant 0 : index
    %c0_9 = arith.constant 0 : index
    %15 = vector.load %arg6[%c0_8, %c0_9] : memref<1x96xf32, #tpu.memory_space<vmem>>, vector<1x96xf32>
    %16 = vector.broadcast %15 : vector<1x96xf32> to vector<56x96xf32>
    %17 = arith.addf %14, %16 : vector<56x96xf32>
    %c0_10 = arith.constant 0 : index
    %c0_11 = arith.constant 0 : index
    %18 = vector.load %arg7[%c0_10, %c0_11] : memref<56x96xf32, #tpu.memory_space<vmem>>, vector<56x96xf32>
    tpu.vector_store %arg7[%c0_10, %c0_11], %17 {strides = array<i32>} : memref<56x96xf32, #tpu.memory_space<vmem>>, vector<56x96xf32>,
    return
  }
  func.func @transform_0(%arg0: i32, %arg1: i32) -> (i32, i32) {
    %c0_i32 = arith.constant 0 : i32
    return %arg0, %arg1 : i32, i32
  }
  func.func @transform_1(%arg0: i32, %arg1: i32) -> (i32, i32) {
    %c0_i32 = arith.constant 0 : i32
    %c0_i32_0 = arith.constant 0 : i32
    return %c0_i32, %arg1 : i32, i32
  }
  func.func @transform_2(%arg0: i32, %arg1: i32) -> (i32, i32) {
    %c0_i32 = arith.constant 0 : i32
    %c0_i32_0 = arith.constant 0 : i32
    return %c0_i32, %arg1 : i32, i32
  }
  func.func @transform_3(%arg0: i32, %arg1: i32) -> (i32, i32) {
    %c0_i32 = arith.constant 0 : i32
    %c0_i32_0 = arith.constant 0 : i32
    return %c0_i32, %arg1 : i32, i32
  }
  func.func @transform_4(%arg0: i32, %arg1: i32) -> (i32, i32) {
    %c0_i32 = arith.constant 0 : i32
    %c0_i32_0 = arith.constant 0 : i32
    return %c0_i32, %arg1 : i32, i32
  }
  func.func @transform_5(%arg0: i32, %arg1: i32) -> (i32, i32) {
    %c0_i32 = arith.constant 0 : i32
    return %arg0, %arg1 : i32, i32
  }
}

</mosaic_0001>

<bundles_post_ra>
// kernel: tpu_custom_call.1
= control target key start
LH: loop header
LB: loop body
LE: loop exit
PB: predicated region body
PF: predicated region fallthrough
CT: control target
= control target key end

     0   :  { %10 = vsyncpa [#allocation3], 0  ;;  %s290_s0 = inlined_call_operand.hbm [shape: f32[56,96], index: 0, kind: input, shape index: {}]   ;;  %s291_s1 = inlined_call_operand.vmem [shape: f32[1,96], index: 1, kind: input, shape index: {}]   ;;  %s292_s2 = inlined_call_operand.vmem [shape: f32[1,96], index: 2, kind: input, shape index: {}]   ;;  %s293_s3 = inlined_call_operand.vmem [shape: f32[1,96], index: 3, kind: input, shape index: {}]   ;;  %s294_s4 = inlined_call_operand.vmem [shape: f32[1,96], index: 4, kind: input, shape index: {}]   ;;  %s295_s5 = inlined_call_operand.hbm [shape: f32[56,96], index: 5, kind: output, shape index: {}]  }
   0x1   :  { %11 = vsyncpa [#allocation4], 0  ;;  %s207_s18 = smov [#allocation2]   ;;  %s159_s22 = scalar_lea.hbm %s290_s0, 896 }
   0x2   :  { %s17_s19 = sshll.u32 %s207_s18, 4  ;;  %p160_p0 = scmp.ne.s32.totalorder %s290_s0, %s159_s22  ;;  %s18_s19 = int_to_ptr.vmem [resolvable:$true] %s17_s19 }
   0x3   :  { %p163_p1 = scmp.lt.u32.totalorder %s159_s22, %s290_s0 }
   0x5   :  { %p165_p2 = pnand %p163_p1, %p160_p0 }
   0x7   :  { %168 = shalt.err (!%p165_p2)
}
   0x8   :  { %s169_s27 = scalar_lea.vmem %s18_s19, 896  ;;  %p174_p4 = scmp.lt.s32.totalorder %s18_s19, %s18_s19 }
   0x9   :  { %p170_p3 = scmp.ne.s32.totalorder %s18_s19, %s169_s27  ;;  %p175_p5 = scmp.lt.s32.totalorder %s169_s27, %s169_s27 }
   0xb   :  { %p176_p6 = por %p175_p5, %p174_p4 }
   0xd   :  { %p177_p7 = pnand %p176_p6, %p170_p3 }
   0xf   :  { %180 = shalt.err (!%p177_p7)
}
  0x10   :  { %s208_s28 = smov 128   ;;  %s209_s29 = smov 8  }
  0x11   :  { %23 = dma.hbm_to_vmem [thread:$0]  %s290_s0, 896, %s18_s19, [#allocation3], %s208_s28, %s208_s28, %s209_s29  }
  0x12   :  { %203 = dma.done.wait [#allocation3], 896  }
  0x13   :  { %204 = vsyncadd [#allocation3], 4294966400  ;;  %v35_v0 = vld [vmem:[#allocation2] sm:$0xff]  ;;  %v36_v4 = vld [vmem:[#allocation2 + $0x8] sm:$0xff]  ;;  %vm119_vm0 = vcmask 785408  }
  0x14   :  { %v144_v1 = vld [vmem:[%s291_s1] ss:$0 sm:$0xff]  ;;  %v37_v6 = vld [vmem:[#allocation2 + $0x10] sm:$0xff]  ;;  %v38_v7 = vld [vmem:[#allocation2 + $0x18] sm:$0xff] }
  0x15   :  { %v145_v2 = vld [vmem:[%s292_s2] ss:$0 sm:$0xff]  ;;  %v49_v3 = vmul.f32 %v144_v1, %v35_v0  ;;  %v50_v5 = vmul.f32 %v144_v1, %v36_v4  ;;  %v51_v10 = vmul.f32 %v144_v1, %v37_v6  ;;  %v52_v11 = vmul.f32 %v144_v1, %v38_v7  ;;  %v40_v13 = vld [vmem:[#allocation2 + $0x28] sm:$0xff]  ;;  %v41_v14 = vld [vmem:[#allocation2 + $0x30] sm:$0xff] }
  0x16   :  { %v39_v8 = vld [vmem:[#allocation2 + $0x20] sm:$0xff]  ;;  %v54_v16 = vmul.f32 %v144_v1, %v40_v13  ;;  %v55_v17 = vmul.f32 %v144_v1, %v41_v14 }
  0x17   :  { %v63_v9 = vadd.f32 %v145_v2, %v49_v3  ;;  %v53_v12 = vmul.f32 %v144_v1, %v39_v8  ;;  %v64_v15 = vadd.f32 %v145_v2, %v50_v5  ;;  %v65_v19 = vadd.f32 %v145_v2, %v51_v10  ;;  %v146_v29 = vld [vmem:[%s293_s3] ss:$0 sm:$0xff]  ;;  %s210_s3 = smov [#allocation5]  }
  0x18   :  { %v66_v20 = vadd.f32 %v145_v2, %v52_v11  ;;  %v68_v23 = vadd.f32 %v145_v2, %v54_v16  ;;  %v69_v24 = vadd.f32 %v145_v2, %v55_v17  ;;  %v147_v37 = vld [vmem:[%s294_s4] ss:$0 sm:$0xff]  ;;  %s132_s12 = sshll.u32 %s210_s3, 4  ;;  %s133_s12 = int_to_ptr.vmem [resolvable:$true] %s132_s12 }
  0x19   :  { %v148_v18 = vround.rtne.f32 %v63_v9  ;;  %v67_v21 = vadd.f32 %v145_v2, %v53_v12  ;;  %v149_v22 = vround.rtne.f32 %v64_v15  ;;  %v150_v26 = vround.rtne.f32 %v65_v19  ;;  %s181_s4 = scalar_lea.vmem %s133_s12, 896  ;;  %p186_p9 = scmp.lt.s32.totalorder %s133_s12, %s133_s12 }
  0x1a   :  { %v151_v27 = vround.rtne.f32 %v66_v20  ;;  %v153_v31 = vround.rtne.f32 %v68_v23  ;;  %v154_v32 = vround.rtne.f32 %v69_v24  ;;  %p182_p8 = scmp.ne.s32.totalorder %s133_s12, %s181_s4  ;;  %p187_p10 = scmp.lt.s32.totalorder %s181_s4, %s181_s4 }
  0x1b   :  { %v77_v25 = vmax.f32 %v148_v18, 0.0  ;;  %v152_v28 = vround.rtne.f32 %v67_v21  ;;  %v78_v30 = vmax.f32 %v149_v22, 0.0  ;;  %v79_v34 = vmax.f32 %v150_v26, 0.0 }
  0x1c   :  { %v80_v35 = vmax.f32 %v151_v27, 0.0  ;;  %v82_v39 = vmax.f32 %v153_v31, 0.0  ;;  %v83_v40 = vmax.f32 %v154_v32, 0.0  ;;  %p188_p11 = por %p187_p10, %p186_p9 }
  0x1d   :  { %v84_v33 = vmin.f32 %v77_v25, 15.0  ;;  %v81_v36 = vmax.f32 %v152_v28, 0.0  ;;  %v85_v38 = vmin.f32 %v78_v30, 15.0  ;;  %v86_v42 = vmin.f32 %v79_v34, 15.0 }
  0x1e   :  { %v87_v43 = vmin.f32 %v80_v35, 15.0  ;;  %v89_v46 = vmin.f32 %v82_v39, 15.0  ;;  %v90_v47 = vmin.f32 %v83_v40, 15.0  ;;  %p189_p12 = pnand %p188_p11, %p182_p8 }
  0x1f   :  { %v98_v41 = vmul.f32 %v146_v29, %v84_v33  ;;  %v88_v44 = vmin.f32 %v81_v36, 15.0  ;;  %v99_v45 = vmul.f32 %v146_v29, %v85_v38  ;;  %v100_v49 = vmul.f32 %v146_v29, %v86_v42 }
  0x20   :  { %v101_v50 = vmul.f32 %v146_v29, %v87_v43  ;;  %v103_v53 = vmul.f32 %v146_v29, %v89_v46  ;;  %v104_v54 = vmul.f32 %v146_v29, %v90_v47 }
  0x21   :  { %v112_v48 = vadd.f32 %v147_v37, %v98_v41  ;;  %v102_v51 = vmul.f32 %v146_v29, %v88_v44  ;;  %v113_v52 = vadd.f32 %v147_v37, %v99_v45  ;;  %v114_v55 = vadd.f32 %v147_v37, %v100_v49 }
  0x22   :  { %v115_v56 = vadd.f32 %v147_v37, %v101_v50  ;;  %v117_v58 = vadd.f32 %v147_v37, %v103_v53  ;;  %v118_v59 = vadd.f32 %v147_v37, %v104_v54 }
  0x23   :  { %120 = vst.msk [vmem:[#allocation5] sm:$0xff] %vm119_vm0, %v112_v48  ;;  %v116_v57 = vadd.f32 %v147_v37, %v102_v51  ;;  %121 = vst.msk [vmem:[#allocation5 + $0x8] sm:$0xff] %vm119_vm0, %v113_v52 }
  0x24   :  { %122 = vst.msk [vmem:[#allocation5 + $0x10] sm:$0xff] %vm119_vm0, %v114_v55  ;;  %123 = vst.msk [vmem:[#allocation5 + $0x18] sm:$0xff] %vm119_vm0, %v115_v56 }
  0x25   :  { %124 = vst.msk [vmem:[#allocation5 + $0x20] sm:$0xff] %vm119_vm0, %v116_v57  ;;  %125 = vst.msk [vmem:[#allocation5 + $0x28] sm:$0xff] %vm119_vm0, %v117_v58 }
  0x26   :  { %126 = vst.msk [vmem:[#allocation5 + $0x30] sm:$0xff] %vm119_vm0, %v118_v59 }
  0x27   :  { %192 = shalt.err (!%p189_p12)
}
  0x28   :  { %s193_s15 = scalar_lea.hbm %s295_s5, 896 }
  0x29   :  { %p194_p13 = scmp.ne.s32.totalorder %s295_s5, %s193_s15  ;;  %p197_p0 = scmp.lt.u32.totalorder %s193_s15, %s295_s5 }
  0x2b   :  { %p199_p1 = pnand %p197_p0, %p194_p13 }
  0x2d   :  { %202 = shalt.err (!%p199_p1)
}
  0x2e   :  { %138 = dma.vmem_to_hbm [thread:$0]  %s133_s12, 896, %s295_s5, [#allocation4], %s208_s28, %s208_s28, %s209_s29  }
  0x2f   :  { %205 = dma.done.wait [#allocation4], 896  }
  0x30   :  { %206 = vsyncadd [#allocation4], 4294966400 }
  0x31   :  { %142 = vsyncpa [#allocation3], 1 }
  0x32   :  { %143 = vsyncpa [#allocation4], 1 }

</bundles_post_ra>
